<compile_context>
chip_gen: v5e
topology: v5e:2x2
jax: 0.10.0
libtpu: 0.0.40
codegen_flags: <defaults>
</compile_context>

<pallas_src>
import jax
import jax.numpy as jnp
import numpy as np
from jax.experimental import pallas as pl
from jax.experimental.pallas import tpu as pltpu

MAX_PAD = 3                       # largest conv padding (kernel_size=7 -> pad 3)
N_TAPS = 2 * MAX_PAD + 1          # 7
KERNEL_SIZES = (1, 3, 5, 7)
LANE = 128


def _round_up(x, m):
    return -(-x // m) * m


# ---------------------------------------------------------------------------
# Pallas kernel
# ---------------------------------------------------------------------------
def _branch(x_ref, w_ref, b_ref, pool_ref):
    """Fused 4-conv branch: im2col -> one bf16 MXU matmul -> bias -> ReLU -> pool.

    x_ref:    (BB, T + 2*MAX_PAD, H) padded bf16 activations.
    w_ref:    (K_pad, 4*H) packed bf16 conv weights (K_pad = 7H rounded to 128).
    b_ref:    (1, 4*H) f32 biases.
    pool_ref: (BB, BB*T) f32 block-diagonal averaging matrix (host-built).
    Returns (BB, 4*H) f32.
    """
    bb, tp, h = x_ref.shape
    t = tp - 2 * MAX_PAD
    k_pad = w_ref.shape[0]
    x = x_ref[...]                                                # (BB, T+6, H) bf16
    # im2col slab: 7 shifted views (+ zero fragment to reach K_pad) along lanes
    frags = [x[:, j:j + t, :] for j in range(N_TAPS)]
    extra = k_pad - N_TAPS * h
    if extra:
        frags.append(jnp.zeros((bb, t, extra), x.dtype))
    slab = jnp.concatenate(frags, axis=-1).reshape(bb * t, k_pad)  # (BB*T, K_pad)
    acc = jnp.dot(slab, w_ref[...], preferred_element_type=jnp.float32)
    acc = jnp.maximum(acc + b_ref[...], 0.0)                      # (BB*T, 4H) f32
    # AdaptiveAvgPool1d(1) folded into an MXU matmul (per-block mean over T)
    return jnp.dot(pool_ref[...], acc,
                   preferred_element_type=jnp.float32)            # (BB, 4H)


def _three_inputs_kernel(title_ref, full_ref, cat_ref,
                         tw, tb, tpool, fw, fb, fpool,
                         cw, cb, iw, ib, dw, db,
                         out_ref):
    h = title_ref.shape[2]
    bb = title_ref.shape[0]

    title_vec = _branch(title_ref, tw, tb, tpool)                 # (BB, 4H) f32
    full_vec = _branch(full_ref, fw, fb, fpool)                   # (BB, 4H) f32

    cat = cat_ref[...].reshape(bb, cat_ref.shape[2])              # (BB, n_cat) f32
    cat_vec = jnp.dot(cat, cw[...],
                      preferred_element_type=jnp.float32) + cb[...]  # (BB, nf3*H)

    # inter_dense as a sum of row-slice matmuls (avoids a 288-lane concat)
    iw_full = iw[...]                                             # (9H, 2H) f32
    hid = (jnp.dot(title_vec, iw_full[0:4 * h, :],
                   preferred_element_type=jnp.float32)
           + jnp.dot(full_vec, iw_full[4 * h:8 * h, :],
                     preferred_element_type=jnp.float32)
           + jnp.dot(cat_vec, iw_full[8 * h:, :],
                     preferred_element_type=jnp.float32)
           + ib[...])
    hid = jnp.maximum(hid, 0.0)                                   # (BB, 2H) f32

    # final_dense: N=1 matmul replaced by VPU multiply + lane reduce; the
    # reduce lands directly in the lane-dense (1, BB) output orientation.
    out_row = jnp.sum(hid * dw[...], axis=-1).reshape(1, bb) + db[...]   # (1, BB)
    out_ref[...] = out_row.reshape(out_ref.shape).astype(out_ref.dtype)


# ---------------------------------------------------------------------------
# Host-side packing (conv branches -> single bf16 im2col slab per input)
# ---------------------------------------------------------------------------
def _pack_conv(ws, bs, hid):
    """ws[c]: (k_c, H_in, H_out) -> bf16 (K_pad, 4*H); bs[c]: (1, H) -> f32 (1, 4H)."""
    k_pad = _round_up(N_TAPS * hid, LANE)
    wp = jnp.zeros((k_pad, len(ws) * hid), jnp.float32)
    for c, w in enumerate(ws):
        k = w.shape[0]
        off = MAX_PAD - (k - 1) // 2
        wp = wp.at[off * hid:(off + k) * hid, c * hid:(c + 1) * hid].set(
            w.reshape(k * hid, hid))
    bp = jnp.concatenate([b.reshape(1, hid) for b in bs], axis=1)
    return wp.astype(jnp.bfloat16), bp.astype(jnp.float32)


def _pool_matrix(bb, t):
    """Block-diagonal averaging matrix P (bb, bb*t): P @ x == per-block mean over t."""
    m = np.zeros((bb, bb * t), np.float32)
    for r in range(bb):
        m[r, r * t:(r + 1) * t] = 1.0 / t
    return jnp.asarray(m)


# ---------------------------------------------------------------------------
# Wrapper (glue: embedding gather, padding, batch blocking, BlockSpecs)
# ---------------------------------------------------------------------------
def three_inputs_net_forward(input1, input2, input3, params):
    B = input1.shape[0]
    H = params["title_emb"].shape[1]
    C = input3.shape[1]
    Tt, Tf = input1.shape[1], input2.shape[1]

    # Batch-block size: target >= 256 MXU rows per step (BB * T_title), a single
    # grid step when B is small (serial grid on single-TC chips), and caps so the
    # per-step buffers and pool matrices stay far below the scoped VMEM limit.
    BB = max(1, -(-256 // max(Tt, 1)))
    BB = min(BB, max(1, 4096 // max(Tt, Tf, 1)), 512, B)
    num_blocks = -(-B // BB)
    B_pad = num_blocks * BB

    # glue: embedding lookup (data-dependent gather) + seq zero-pad + batch pad,
    # cast to bf16 for the MXU / to halve the HBM->VMEM DMA bytes.
    def prep(ids, emb):
        x = emb[ids].astype(jnp.bfloat16)                         # (B, T, H)
        return jnp.pad(x, ((0, B_pad - B), (MAX_PAD, MAX_PAD), (0, 0)))

    title_x = prep(input1, params["title_emb"])
    full_x = prep(input2, params["full_emb"])
    cat_x = jnp.pad(input3.astype(jnp.float32),
                    ((0, B_pad - B), (0, 0))).reshape(B_pad, 1, C)

    tw, tb = _pack_conv(params["t_ws"], params["t_bs"], H)        # bf16 (K_pad,4H)
    fw, fb = _pack_conv(params["f_ws"], params["f_bs"], H)
    tpool = _pool_matrix(BB, Tt)                                  # f32 (BB, BB*Tt)
    fpool = _pool_matrix(BB, Tf)                                  # f32 (BB, BB*Tf)
    dw_row = params["final_w"].reshape(1, -1).astype(jnp.float32)  # (1, 2H) lane-dense

    weights = [tw, tb, tpool, fw, fb, fpool,
               params["cat_w"], params["cat_b"],
               params["inter_w"], params["inter_b"],
               dw_row, params["final_b"]]                          # all 2-D

    def rep(a):  # replicated (grid-invariant) weight spec, full-array block
        return pl.BlockSpec(a.shape, lambda b: (0, 0))

    in_specs = [
        pl.BlockSpec((BB, Tt + 2 * MAX_PAD, H), lambda b: (b, 0, 0)),
        pl.BlockSpec((BB, Tf + 2 * MAX_PAD, H), lambda b: (b, 0, 0)),
        pl.BlockSpec((BB, 1, C), lambda b: (b, 0, 0)),
    ] + [rep(w) for w in weights]

    # rough per-step VMEM budget -> vmem_limit (kept < v7x's 64 MiB physical)
    k_pad = _round_up(N_TAPS * H, LANE)
    est = (4 * BB * (Tt + Tf + 4 * MAX_PAD) * H * 2               # act blocks x2 bufs
           + 2 * BB * max(Tt, Tf) * (k_pad * 2 + 4 * H * 4)       # slab + f32 acc
           + 4 * BB * BB * (Tt + Tf) * 4                          # pool matrices
           + 4 * (1 << 20))                                       # weights + headroom
    vmem_limit = int(min(56 * (1 << 20), max(32 * (1 << 20), 2 * est)))

    out = pl.pallas_call(
        _three_inputs_kernel,
        out_shape=jax.ShapeDtypeStruct((num_blocks, 1, BB), jnp.float32),
        grid=(num_blocks,),
        in_specs=in_specs,
        out_specs=pl.BlockSpec((1, 1, BB), lambda b: (b, 0, 0)),
        compiler_params=pltpu.CompilerParams(
            dimension_semantics=("parallel",),
            vmem_limit_bytes=vmem_limit),
    )(title_x, full_x, cat_x, *weights)
    return out.reshape(B_pad)[:B].reshape(B, 1)


# ---------------------------------------------------------------------------
# Deterministic parameter init (synthetic; kernel-friendly layouts)
# ---------------------------------------------------------------------------
def init_params(key, n_tokens, n_cat, num_features_3=1, hid=32):
    keys = iter(jax.random.split(key, 32))

    def u(shape, fan_in):
        bound = 1.0 / np.sqrt(fan_in)
        return jax.random.uniform(next(keys), shape, jnp.float32, -bound, bound)

    p = {
        "title_emb": jax.random.normal(next(keys), (n_tokens, hid), jnp.float32),
        "full_emb": jax.random.normal(next(keys), (n_tokens, hid), jnp.float32),
        # conv weights stored as (k, H_in, H_out)  (torch: (H_out, H_in, k))
        "t_ws": [u((k, hid, hid), hid * k) for k in KERNEL_SIZES],
        "t_bs": [u((1, hid), hid * k) for k in KERNEL_SIZES],
        "f_ws": [u((k, hid, hid), hid * k) for k in KERNEL_SIZES],
        "f_bs": [u((1, hid), hid * k) for k in KERNEL_SIZES],
        # dense weights stored transposed: (in, out)
        "cat_w": u((n_cat, num_features_3 * hid), n_cat),
        "cat_b": u((1, num_features_3 * hid), n_cat),
    }
    concat_feats = (4 + 4 + num_features_3) * hid
    p["inter_w"] = u((concat_feats, 2 * hid), concat_feats)
    p["inter_b"] = u((1, 2 * hid), concat_feats)
    p["final_w"] = u((2 * hid, 1), 2 * hid)
    p["final_b"] = u((1, 1), 2 * hid)
    return p


# ---------------------------------------------------------------------------
# Pure-JAX reference (same math as the PyTorch forward, f32 HIGHEST precision)
# ---------------------------------------------------------------------------
def reference_forward(input1, input2, input3, p):
    def branch(ids, emb, ws, bs):
        x = jnp.pad(emb[ids], ((0, 0), (MAX_PAD, MAX_PAD), (0, 0)))
        T = ids.shape[1]
        feats = []
        for w, b in zip(ws, bs):
            k = w.shape[0]
            off = MAX_PAD - (k - 1) // 2
            acc = jnp.zeros((ids.shape[0], T, w.shape[2]), jnp.float32)
            for j in range(k):
                acc = acc + jnp.einsum("bti,io->bto",
                                       x[:, off + j: off + j + T, :], w[j],
                                       precision=jax.lax.Precision.HIGHEST)
            acc = jnp.maximum(acc + b[None], 0.0)
            feats.append(acc.mean(axis=1))
        return jnp.concatenate(feats, axis=1)

    t = branch(input1, p["title_emb"], p["t_ws"], p["t_bs"])
    f = branch(input2, p["full_emb"], p["f_ws"], p["f_bs"])
    c = input3 @ p["cat_w"] + p["cat_b"]
    cc = jnp.concatenate([t, f, c], axis=1)
    h = jnp.maximum(cc @ p["inter_w"] + p["inter_b"], 0.0)
    return h @ p["final_w"] + p["final_b"]


# ---------------------------------------------------------------------------
if __name__ == "__main__":
    key = jax.random.PRNGKey(0)
    n_tokens, n_cat, hid = 50, 8, 32
    B, T_title, T_full = 2, 8, 12

    pkey, k1, k2, k3 = jax.random.split(key, 4)
    params = init_params(pkey, n_tokens, n_cat, num_features_3=1, hid=hid)
    input1 = jax.random.randint(k1, (B, T_title), 0, n_tokens)   # title token ids
    input2 = jax.random.randint(k2, (B, T_full), 0, n_tokens)    # full-text token ids
    input3 = jax.random.normal(k3, (B, n_cat), jnp.float32)      # categorical features

    out = three_inputs_net_forward(input1, input2, input3, params)
    out = jax.block_until_ready(out)

    ref = reference_forward(input1, input2, input3, params)
    # bf16 operands on the MXU path (f32 accumulation) -> ~1e-2 tolerance
    np.testing.assert_allclose(np.asarray(out), np.asarray(ref), rtol=1e-2, atol=1e-2)
    print("KERNEL_OK")
</pallas_src>

<mosaic_0001>
module attributes {stable_mosaic.version = 11 : i64} {
  func.func @_three_inputs_kernel(%arg0: i32, %arg1: memref<2x14x32xbf16, #tpu.memory_space<vmem>>, %arg2: memref<2x18x32xbf16, #tpu.memory_space<vmem>>, %arg3: memref<2x1x8xf32, #tpu.memory_space<vmem>>, %arg4: memref<256x128xbf16, #tpu.memory_space<vmem>>, %arg5: memref<1x128xf32, #tpu.memory_space<vmem>>, %arg6: memref<2x16xf32, #tpu.memory_space<vmem>>, %arg7: memref<256x128xbf16, #tpu.memory_space<vmem>>, %arg8: memref<1x128xf32, #tpu.memory_space<vmem>>, %arg9: memref<2x24xf32, #tpu.memory_space<vmem>>, %arg10: memref<8x32xf32, #tpu.memory_space<vmem>>, %arg11: memref<1x32xf32, #tpu.memory_space<vmem>>, %arg12: memref<288x64xf32, #tpu.memory_space<vmem>>, %arg13: memref<1x64xf32, #tpu.memory_space<vmem>>, %arg14: memref<1x64xf32, #tpu.memory_space<vmem>>, %arg15: memref<1x1xf32, #tpu.memory_space<vmem>>, %arg16: memref<1x1x2xf32, #tpu.memory_space<vmem>>) attributes {dimension_semantics = [#tpu.dimension_semantics<parallel>], iteration_bounds = array<i64: 1>, scalar_prefetch = 0 : i64, scratch_operands = 0 : i64, tpu.core_type = #tpu.core_type<tc>, window_params = [{transform_indices = @transform_0, window_bounds = array<i64: 2, 14, 32>}, {transform_indices = @transform_1, window_bounds = array<i64: 2, 18, 32>}, {transform_indices = @transform_2, window_bounds = array<i64: 2, 1, 8>}, {pipeline_mode = #tpu.pipeline_mode<synchronous>, transform_indices = @transform_3, window_bounds = array<i64: 256, 128>}, {pipeline_mode = #tpu.pipeline_mode<synchronous>, transform_indices = @transform_4, window_bounds = array<i64: 1, 128>}, {pipeline_mode = #tpu.pipeline_mode<synchronous>, transform_indices = @transform_5, window_bounds = array<i64: 2, 16>}, {pipeline_mode = #tpu.pipeline_mode<synchronous>, transform_indices = @transform_6, window_bounds = array<i64: 256, 128>}, {pipeline_mode = #tpu.pipeline_mode<synchronous>, transform_indices = @transform_7, window_bounds = array<i64: 1, 128>}, {pipeline_mode = #tpu.pipeline_mode<synchronous>, transform_indices = @transform_8, window_bounds = array<i64: 2, 24>}, {pipeline_mode = #tpu.pipeline_mode<synchronous>, transform_indices = @transform_9, window_bounds = array<i64: 8, 32>}, {pipeline_mode = #tpu.pipeline_mode<synchronous>, transform_indices = @transform_10, window_bounds = array<i64: 1, 32>}, {pipeline_mode = #tpu.pipeline_mode<synchronous>, transform_indices = @transform_11, window_bounds = array<i64: 288, 64>}, {pipeline_mode = #tpu.pipeline_mode<synchronous>, transform_indices = @transform_12, window_bounds = array<i64: 1, 64>}, {pipeline_mode = #tpu.pipeline_mode<synchronous>, transform_indices = @transform_13, window_bounds = array<i64: 1, 64>}, {pipeline_mode = #tpu.pipeline_mode<synchronous>, transform_indices = @transform_14, window_bounds = array<i64: 1, 1>}, {transform_indices = @transform_15, window_bounds = array<i64: 1, 1, 2>}]} {
    %c0 = arith.constant 0 : index
    %c0_0 = arith.constant 0 : index
    %c0_1 = arith.constant 0 : index
    %0 = vector.load %arg1[%c0, %c0_0, %c0_1] : memref<2x14x32xbf16, #tpu.memory_space<vmem>>, vector<2x14x32xbf16>
    %1 = vector.extract_strided_slice %0 {offsets = [0, 0, 0], sizes = [2, 8, 32], strides = [1, 1, 1]} : vector<2x14x32xbf16> to vector<2x8x32xbf16>
    %2 = vector.extract_strided_slice %0 {offsets = [0, 1, 0], sizes = [2, 8, 32], strides = [1, 1, 1]} : vector<2x14x32xbf16> to vector<2x8x32xbf16>
    %3 = vector.extract_strided_slice %0 {offsets = [0, 2, 0], sizes = [2, 8, 32], strides = [1, 1, 1]} : vector<2x14x32xbf16> to vector<2x8x32xbf16>
    %4 = vector.extract_strided_slice %0 {offsets = [0, 3, 0], sizes = [2, 8, 32], strides = [1, 1, 1]} : vector<2x14x32xbf16> to vector<2x8x32xbf16>
    %5 = vector.extract_strided_slice %0 {offsets = [0, 4, 0], sizes = [2, 8, 32], strides = [1, 1, 1]} : vector<2x14x32xbf16> to vector<2x8x32xbf16>
    %6 = vector.extract_strided_slice %0 {offsets = [0, 5, 0], sizes = [2, 8, 32], strides = [1, 1, 1]} : vector<2x14x32xbf16> to vector<2x8x32xbf16>
    %7 = vector.extract_strided_slice %0 {offsets = [0, 6, 0], sizes = [2, 8, 32], strides = [1, 1, 1]} : vector<2x14x32xbf16> to vector<2x8x32xbf16>
    %cst = arith.constant 0.000000e+00 : bf16
    %8 = vector.broadcast %cst : bf16 to vector<2x8x32xbf16>
    %9 = tpu.concatenate %1, %2, %3, %4, %5, %6, %7, %8 in 2 : vector<2x8x32xbf16>, vector<2x8x32xbf16>, vector<2x8x32xbf16>, vector<2x8x32xbf16>, vector<2x8x32xbf16>, vector<2x8x32xbf16>, vector<2x8x32xbf16>, vector<2x8x32xbf16> -> vector<2x8x256xbf16>
    %10 = vector.shape_cast %9 : vector<2x8x256xbf16> to vector<16x256xbf16>
    %c0_2 = arith.constant 0 : index
    %c0_3 = arith.constant 0 : index
    %11 = vector.load %arg4[%c0_2, %c0_3] : memref<256x128xbf16, #tpu.memory_space<vmem>>, vector<256x128xbf16>
    %cst_4 = arith.constant dense<0.000000e+00> : vector<16x128xf32>
    %12 = tpu.matmul %10, %11, %cst_4 {dimension_numbers = #tpu.dot_dimension_numbers<[1], [0], [0], [1], [0, 0, 1, 1], [], []>} : vector<16x256xbf16>, vector<256x128xbf16>, vector<16x128xf32> -> vector<16x128xf32>
    %c0_5 = arith.constant 0 : index
    %c0_6 = arith.constant 0 : index
    %13 = vector.load %arg5[%c0_5, %c0_6] : memref<1x128xf32, #tpu.memory_space<vmem>>, vector<1x128xf32>
    %14 = vector.broadcast %13 : vector<1x128xf32> to vector<16x128xf32>
    %15 = arith.addf %12, %14 : vector<16x128xf32>
    %cst_7 = arith.constant 0.000000e+00 : f32
    %16 = vector.broadcast %cst_7 : f32 to vector<16x128xf32>
    %17 = arith.maximumf %15, %16 : vector<16x128xf32>
    %c0_8 = arith.constant 0 : index
    %c0_9 = arith.constant 0 : index
    %18 = vector.load %arg6[%c0_8, %c0_9] : memref<2x16xf32, #tpu.memory_space<vmem>>, vector<2x16xf32>
    %cst_10 = arith.constant dense<0.000000e+00> : vector<2x128xf32>
    %19 = tpu.matmul %18, %17, %cst_10 {dimension_numbers = #tpu.dot_dimension_numbers<[1], [0], [0], [1], [0, 0, 1, 1], [], []>} : vector<2x16xf32>, vector<16x128xf32>, vector<2x128xf32> -> vector<2x128xf32>
    %c0_11 = arith.constant 0 : index
    %c0_12 = arith.constant 0 : index
    %c0_13 = arith.constant 0 : index
    %20 = vector.load %arg2[%c0_11, %c0_12, %c0_13] : memref<2x18x32xbf16, #tpu.memory_space<vmem>>, vector<2x18x32xbf16>
    %21 = vector.extract_strided_slice %20 {offsets = [0, 0, 0], sizes = [2, 12, 32], strides = [1, 1, 1]} : vector<2x18x32xbf16> to vector<2x12x32xbf16>
    %22 = vector.extract_strided_slice %20 {offsets = [0, 1, 0], sizes = [2, 12, 32], strides = [1, 1, 1]} : vector<2x18x32xbf16> to vector<2x12x32xbf16>
    %23 = vector.extract_strided_slice %20 {offsets = [0, 2, 0], sizes = [2, 12, 32], strides = [1, 1, 1]} : vector<2x18x32xbf16> to vector<2x12x32xbf16>
    %24 = vector.extract_strided_slice %20 {offsets = [0, 3, 0], sizes = [2, 12, 32], strides = [1, 1, 1]} : vector<2x18x32xbf16> to vector<2x12x32xbf16>
    %25 = vector.extract_strided_slice %20 {offsets = [0, 4, 0], sizes = [2, 12, 32], strides = [1, 1, 1]} : vector<2x18x32xbf16> to vector<2x12x32xbf16>
    %26 = vector.extract_strided_slice %20 {offsets = [0, 5, 0], sizes = [2, 12, 32], strides = [1, 1, 1]} : vector<2x18x32xbf16> to vector<2x12x32xbf16>
    %27 = vector.extract_strided_slice %20 {offsets = [0, 6, 0], sizes = [2, 12, 32], strides = [1, 1, 1]} : vector<2x18x32xbf16> to vector<2x12x32xbf16>
    %cst_14 = arith.constant 0.000000e+00 : bf16
    %28 = vector.broadcast %cst_14 : bf16 to vector<2x12x32xbf16>
    %29 = tpu.concatenate %21, %22, %23, %24, %25, %26, %27, %28 in 2 : vector<2x12x32xbf16>, vector<2x12x32xbf16>, vector<2x12x32xbf16>, vector<2x12x32xbf16>, vector<2x12x32xbf16>, vector<2x12x32xbf16>, vector<2x12x32xbf16>, vector<2x12x32xbf16> -> vector<2x12x256xbf16>
    %30 = vector.shape_cast %29 : vector<2x12x256xbf16> to vector<24x256xbf16>
    %c0_15 = arith.constant 0 : index
    %c0_16 = arith.constant 0 : index
    %31 = vector.load %arg7[%c0_15, %c0_16] : memref<256x128xbf16, #tpu.memory_space<vmem>>, vector<256x128xbf16>
    %cst_17 = arith.constant dense<0.000000e+00> : vector<24x128xf32>
    %32 = tpu.matmul %30, %31, %cst_17 {dimension_numbers = #tpu.dot_dimension_numbers<[1], [0], [0], [1], [0, 0, 1, 1], [], []>} : vector<24x256xbf16>, vector<256x128xbf16>, vector<24x128xf32> -> vector<24x128xf32>
    %c0_18 = arith.constant 0 : index
    %c0_19 = arith.constant 0 : index
    %33 = vector.load %arg8[%c0_18, %c0_19] : memref<1x128xf32, #tpu.memory_space<vmem>>, vector<1x128xf32>
    %34 = vector.broadcast %33 : vector<1x128xf32> to vector<24x128xf32>
    %35 = arith.addf %32, %34 : vector<24x128xf32>
    %cst_20 = arith.constant 0.000000e+00 : f32
    %36 = vector.broadcast %cst_20 : f32 to vector<24x128xf32>
    %37 = arith.maximumf %35, %36 : vector<24x128xf32>
    %c0_21 = arith.constant 0 : index
    %c0_22 = arith.constant 0 : index
    %38 = vector.load %arg9[%c0_21, %c0_22] : memref<2x24xf32, #tpu.memory_space<vmem>>, vector<2x24xf32>
    %cst_23 = arith.constant dense<0.000000e+00> : vector<2x128xf32>
    %39 = tpu.matmul %38, %37, %cst_23 {dimension_numbers = #tpu.dot_dimension_numbers<[1], [0], [0], [1], [0, 0, 1, 1], [], []>} : vector<2x24xf32>, vector<24x128xf32>, vector<2x128xf32> -> vector<2x128xf32>
    %c0_24 = arith.constant 0 : index
    %c0_25 = arith.constant 0 : index
    %c0_26 = arith.constant 0 : index
    %40 = vector.load %arg3[%c0_24, %c0_25, %c0_26] : memref<2x1x8xf32, #tpu.memory_space<vmem>>, vector<2x1x8xf32>
    %41 = vector.shape_cast %40 : vector<2x1x8xf32> to vector<2x8xf32>
    %c0_27 = arith.constant 0 : index
    %c0_28 = arith.constant 0 : index
    %42 = vector.load %arg10[%c0_27, %c0_28] : memref<8x32xf32, #tpu.memory_space<vmem>>, vector<8x32xf32>
    %cst_29 = arith.constant dense<0.000000e+00> : vector<2x32xf32>
    %43 = tpu.matmul %41, %42, %cst_29 {dimension_numbers = #tpu.dot_dimension_numbers<[1], [0], [0], [1], [0, 0, 1, 1], [], []>} : vector<2x8xf32>, vector<8x32xf32>, vector<2x32xf32> -> vector<2x32xf32>
    %c0_30 = arith.constant 0 : index
    %c0_31 = arith.constant 0 : index
    %44 = vector.load %arg11[%c0_30, %c0_31] : memref<1x32xf32, #tpu.memory_space<vmem>>, vector<1x32xf32>
    %45 = vector.broadcast %44 : vector<1x32xf32> to vector<2x32xf32>
    %46 = arith.addf %43, %45 : vector<2x32xf32>
    %c0_32 = arith.constant 0 : index
    %c0_33 = arith.constant 0 : index
    %47 = vector.load %arg12[%c0_32, %c0_33] : memref<288x64xf32, #tpu.memory_space<vmem>>, vector<288x64xf32>
    %48 = vector.extract_strided_slice %47 {offsets = [0, 0], sizes = [128, 64], strides = [1, 1]} : vector<288x64xf32> to vector<128x64xf32>
    %cst_34 = arith.constant dense<0.000000e+00> : vector<2x64xf32>
    %49 = tpu.matmul %19, %48, %cst_34 {dimension_numbers = #tpu.dot_dimension_numbers<[1], [0], [0], [1], [0, 0, 1, 1], [], []>} : vector<2x128xf32>, vector<128x64xf32>, vector<2x64xf32> -> vector<2x64xf32>
    %50 = vector.extract_strided_slice %47 {offsets = [128, 0], sizes = [128, 64], strides = [1, 1]} : vector<288x64xf32> to vector<128x64xf32>
    %cst_35 = arith.constant dense<0.000000e+00> : vector<2x64xf32>
    %51 = tpu.matmul %39, %50, %cst_35 {dimension_numbers = #tpu.dot_dimension_numbers<[1], [0], [0], [1], [0, 0, 1, 1], [], []>} : vector<2x128xf32>, vector<128x64xf32>, vector<2x64xf32> -> vector<2x64xf32>
    %52 = arith.addf %49, %51 : vector<2x64xf32>
    %53 = vector.extract_strided_slice %47 {offsets = [256, 0], sizes = [32, 64], strides = [1, 1]} : vector<288x64xf32> to vector<32x64xf32>
    %cst_36 = arith.constant dense<0.000000e+00> : vector<2x64xf32>
    %54 = tpu.matmul %46, %53, %cst_36 {dimension_numbers = #tpu.dot_dimension_numbers<[1], [0], [0], [1], [0, 0, 1, 1], [], []>} : vector<2x32xf32>, vector<32x64xf32>, vector<2x64xf32> -> vector<2x64xf32>
    %55 = arith.addf %52, %54 : vector<2x64xf32>
    %c0_37 = arith.constant 0 : index
    %c0_38 = arith.constant 0 : index
    %56 = vector.load %arg13[%c0_37, %c0_38] : memref<1x64xf32, #tpu.memory_space<vmem>>, vector<1x64xf32>
    %57 = vector.broadcast %56 : vector<1x64xf32> to vector<2x64xf32>
    %58 = arith.addf %55, %57 : vector<2x64xf32>
    %cst_39 = arith.constant 0.000000e+00 : f32
    %59 = vector.broadcast %cst_39 : f32 to vector<2x64xf32>
    %60 = arith.maximumf %58, %59 : vector<2x64xf32>
    %c0_40 = arith.constant 0 : index
    %c0_41 = arith.constant 0 : index
    %61 = vector.load %arg14[%c0_40, %c0_41] : memref<1x64xf32, #tpu.memory_space<vmem>>, vector<1x64xf32>
    %62 = vector.broadcast %61 : vector<1x64xf32> to vector<2x64xf32>
    %63 = arith.mulf %60, %62 : vector<2x64xf32>
    %cst_42 = arith.constant dense<0.000000e+00> : vector<2xf32>
    %64 = vector.multi_reduction <add>, %63, %cst_42 [1] : vector<2x64xf32> to vector<2xf32>
    %65 = vector.shape_cast %64 : vector<2xf32> to vector<1x2xf32>
    %c0_43 = arith.constant 0 : index
    %c0_44 = arith.constant 0 : index
    %66 = vector.load %arg15[%c0_43, %c0_44] : memref<1x1xf32, #tpu.memory_space<vmem>>, vector<1x1xf32>
    %67 = vector.broadcast %66 : vector<1x1xf32> to vector<1x2xf32>
    %68 = arith.addf %65, %67 : vector<1x2xf32>
    %69 = vector.shape_cast %68 : vector<1x2xf32> to vector<1x1x2xf32>
    %c0_45 = arith.constant 0 : index
    %c0_46 = arith.constant 0 : index
    %c0_47 = arith.constant 0 : index
    %70 = vector.load %arg16[%c0_45, %c0_46, %c0_47] : memref<1x1x2xf32, #tpu.memory_space<vmem>>, vector<1x1x2xf32>
    tpu.vector_store %arg16[%c0_45, %c0_46, %c0_47], %69 {strides = array<i32>} : memref<1x1x2xf32, #tpu.memory_space<vmem>>, vector<1x1x2xf32>,
    return
  }
  func.func @transform_0(%arg0: i32) -> (i32, i32, i32) {
    %c0_i32 = arith.constant 0 : i32
    %c0_i32_0 = arith.constant 0 : i32
    %c0_i32_1 = arith.constant 0 : i32
    return %arg0, %c0_i32, %c0_i32_0 : i32, i32, i32
  }
  func.func @transform_1(%arg0: i32) -> (i32, i32, i32) {
    %c0_i32 = arith.constant 0 : i32
    %c0_i32_0 = arith.constant 0 : i32
    %c0_i32_1 = arith.constant 0 : i32
    return %arg0, %c0_i32, %c0_i32_0 : i32, i32, i32
  }
  func.func @transform_2(%arg0: i32) -> (i32, i32, i32) {
    %c0_i32 = arith.constant 0 : i32
    %c0_i32_0 = arith.constant 0 : i32
    %c0_i32_1 = arith.constant 0 : i32
    return %arg0, %c0_i32, %c0_i32_0 : i32, i32, i32
  }
  func.func @transform_3(%arg0: i32) -> (i32, i32) {
    %c0_i32 = arith.constant 0 : i32
    %c0_i32_0 = arith.constant 0 : i32
    %c0_i32_1 = arith.constant 0 : i32
    return %c0_i32, %c0_i32_0 : i32, i32
  }
  func.func @transform_4(%arg0: i32) -> (i32, i32) {
    %c0_i32 = arith.constant 0 : i32
    %c0_i32_0 = arith.constant 0 : i32
    %c0_i32_1 = arith.constant 0 : i32
    return %c0_i32, %c0_i32_0 : i32, i32
  }
  func.func @transform_5(%arg0: i32) -> (i32, i32) {
    %c0_i32 = arith.constant 0 : i32
    %c0_i32_0 = arith.constant 0 : i32
    %c0_i32_1 = arith.constant 0 : i32
    return %c0_i32, %c0_i32_0 : i32, i32
  }
  func.func @transform_6(%arg0: i32) -> (i32, i32) {
    %c0_i32 = arith.constant 0 : i32
    %c0_i32_0 = arith.constant 0 : i32
    %c0_i32_1 = arith.constant 0 : i32
    return %c0_i32, %c0_i32_0 : i32, i32
  }
  func.func @transform_7(%arg0: i32) -> (i32, i32) {
    %c0_i32 = arith.constant 0 : i32
    %c0_i32_0 = arith.constant 0 : i32
    %c0_i32_1 = arith.constant 0 : i32
    return %c0_i32, %c0_i32_0 : i32, i32
  }
  func.func @transform_8(%arg0: i32) -> (i32, i32) {
    %c0_i32 = arith.constant 0 : i32
    %c0_i32_0 = arith.constant 0 : i32
    %c0_i32_1 = arith.constant 0 : i32
    return %c0_i32, %c0_i32_0 : i32, i32
  }
  func.func @transform_9(%arg0: i32) -> (i32, i32) {
    %c0_i32 = arith.constant 0 : i32
    %c0_i32_0 = arith.constant 0 : i32
    %c0_i32_1 = arith.constant 0 : i32
    return %c0_i32, %c0_i32_0 : i32, i32
  }
  func.func @transform_10(%arg0: i32) -> (i32, i32) {
    %c0_i32 = arith.constant 0 : i32
    %c0_i32_0 = arith.constant 0 : i32
    %c0_i32_1 = arith.constant 0 : i32
    return %c0_i32, %c0_i32_0 : i32, i32
  }
  func.func @transform_11(%arg0: i32) -> (i32, i32) {
    %c0_i32 = arith.constant 0 : i32
    %c0_i32_0 = arith.constant 0 : i32
    %c0_i32_1 = arith.constant 0 : i32
    return %c0_i32, %c0_i32_0 : i32, i32
  }
  func.func @transform_12(%arg0: i32) -> (i32, i32) {
    %c0_i32 = arith.constant 0 : i32
    %c0_i32_0 = arith.constant 0 : i32
    %c0_i32_1 = arith.constant 0 : i32
    return %c0_i32, %c0_i32_0 : i32, i32
  }
  func.func @transform_13(%arg0: i32) -> (i32, i32) {
    %c0_i32 = arith.constant 0 : i32
    %c0_i32_0 = arith.constant 0 : i32
    %c0_i32_1 = arith.constant 0 : i32
    return %c0_i32, %c0_i32_0 : i32, i32
  }
  func.func @transform_14(%arg0: i32) -> (i32, i32) {
    %c0_i32 = arith.constant 0 : i32
    %c0_i32_0 = arith.constant 0 : i32
    %c0_i32_1 = arith.constant 0 : i32
    return %c0_i32, %c0_i32_0 : i32, i32
  }
  func.func @transform_15(%arg0: i32) -> (i32, i32, i32) {
    %c0_i32 = arith.constant 0 : i32
    %c0_i32_0 = arith.constant 0 : i32
    %c0_i32_1 = arith.constant 0 : i32
    return %arg0, %c0_i32, %c0_i32_0 : i32, i32, i32
  }
}

</mosaic_0001>

<bundles_post_ra>
// kernel: tpu_custom_call.1
= control target key start
LH: loop header
LB: loop body
LE: loop exit
PB: predicated region body
PF: predicated region fallthrough
CT: control target
= control target key end

     0   :  { %s1547_s0 = inlined_call_operand.vmem [shape: bf16[2,14,32], index: 0, kind: input, shape index: {}]   ;;  %s1548_s1 = inlined_call_operand.vmem [shape: bf16[2,18,32], index: 1, kind: input, shape index: {}]   ;;  %s1549_s2 = inlined_call_operand.vmem [shape: f32[2,1,8], index: 2, kind: input, shape index: {}]   ;;  %s1550_s3 = inlined_call_operand.vmem [shape: bf16[256,128], index: 3, kind: input, shape index: {}]   ;;  %s1551_s4 = inlined_call_operand.vmem [shape: f32[1,128], index: 4, kind: input, shape index: {}]   ;;  %s1552_s5 = inlined_call_operand.vmem [shape: f32[2,16], index: 5, kind: input, shape index: {}]   ;;  %s1553_s6 = inlined_call_operand.vmem [shape: bf16[256,128], index: 6, kind: input, shape index: {}]   ;;  %s1554_s7 = inlined_call_operand.vmem [shape: f32[1,128], index: 7, kind: input, shape index: {}]   ;;  %s1555_s8 = inlined_call_operand.vmem [shape: f32[2,24], index: 8, kind: input, shape index: {}]   ;;  %s1556_s9 = inlined_call_operand.vmem [shape: f32[8,32], index: 9, kind: input, shape index: {}]   ;;  %s1557_s10 = inlined_call_operand.vmem [shape: f32[1,32], index: 10, kind: input, shape index: {}]   ;;  %s1558_s11 = inlined_call_operand.vmem [shape: f32[288,64], index: 11, kind: input, shape index: {}]   ;;  %s1559_s12 = inlined_call_operand.vmem [shape: f32[1,64], index: 12, kind: input, shape index: {}]   ;;  %s1560_s13 = inlined_call_operand.vmem [shape: f32[1,64], index: 13, kind: input, shape index: {}]   ;;  %s1561_s14 = inlined_call_operand.<no memory space> [shape: f32[1,1], index: 14, kind: input, shape index: {}]   ;;  %s1562_s15 = inlined_call_operand.hbm [shape: f32[1,1,2], index: 15, kind: output, shape index: {}]  }
   0x1   :  { %v20_v0 = vstv %s1561_s14 }
   0x2   :  { %21 = vst [vmem:[#allocation2] sm:$0x1] %v20_v0 }
   0x3   :  { %v1200_v1 = vld [vmem:[%s1548_s1] sm:$0xff]  ;;  %v351_v2 = vld [vmem:[%s1548_s1 + $0x8] sm:$0x1]  ;;  %vm428_vm0 = vcmask 1044480   ;;  %v1208_v4 = vld [vmem:[%s1548_s1 + $0xc] sm:$0xff]  ;;  %s1110_s14 = smov 32  }
   0x4   :  { %v403_v3 = vunpack.c.l.b16 %v351_v2  ;;  %v354_v5 = vld [vmem:[%s1548_s1 + $0x14] sm:$0x1]  ;;  %v429_v6 = vrot.slane %v1200_v1, 3  ;;  %v366_v7 = vshrl.u32 %v1200_v1, 16  ;;  %v368_v8 = vshll.u32 %v1200_v1, 16  ;;  %s1109_s1 = smov 64  }
   0x5   :  { %v404_v9 = vunpack.c.l.b16 %v354_v5  ;;  %v373_v11 = vshrl.u32 %v1208_v4, 16  ;;  %v375_v12 = vshll.u32 %v1208_v4, 16  ;;  %v383_v13 = vrot.slane %v1200_v1, 1 }
   0x6   :  { %v405_v10 = vpack.c.b16 %v403_v3, %v403_v3  ;;  %v370_v14 = vrot.slane %v368_v8, 1  ;;  %v408_v15 = vrot.slane %v366_v7, 2  ;;  %v409_v16 = vrot.slane %v368_v8, 3 }
   0x7   :  { %v406_v17 = vpack.c.b16 %v404_v9, %v404_v9  ;;  %v416_v20 = vrot.slane %v373_v11, 2  ;;  %v417_v21 = vrot.slane %v375_v12, 3  ;;  %385 = vrot.lane.b32.xlu2 %v383_v13, %s1109_s1  ;;  %v432_v29 = vrot.slane %v1208_v4, 3 }
   0x8   :  { %v430_v18 = vrot.slane %v405_v10, 3  ;;  %v412_v19 = vshll.u32 %v405_v10, 16  ;;  %v371_v22 = vor.u32 %v370_v14, %v366_v7  ;;  %v410_v25 = vor.u32 %v409_v16, %v408_v15 }
   0x9   :  { %v420_v23 = vshll.u32 %v406_v17, 16  ;;  %v418_v27 = vor.u32 %v417_v21, %v416_v20 }
   0xa   :  { %v431_v24 = vsel %vm428_vm0, %v429_v6, %v430_v18  ;;  %379 = vrot.lane.b32.xlu1 %v371_v22, %s1110_s14  ;;  %v414_v26 = vrot.slane %v412_v19, 3 }
   0xb   :  { %435 = vrot.lane.b32.xlu0 %v431_v24, %s1109_s1  ;;  %v422_v28 = vrot.slane %v420_v23, 3 }
   0xc   :  { %22 = vsyncpa [#allocation4], 0  ;;  %vm407_vm1 = vsmask.f32 5376  ;;  %v433_v30 = vrot.slane %v406_v17, 3  ;;  %v377_v38 = vrot.slane %v375_v12, 1 }
   0xd   :  { %v415_v32 = vsel %vm407_vm1, %v410_v25, %v414_v26  ;;  %v423_v33 = vsel %vm407_vm1, %v418_v27, %v422_v28  ;;  %v889_v34 = vld [vmem:[%s1547_s0] sm:$0xf]  ;;  %v1035_v35 = vld [vmem:[%s1547_s0] sm:$0x70]  ;;  %v893_v36 = vld [vmem:[%s1547_s0 + $0x8] sm:$0xf] }
   0xe   :  { %v434_v31 = vsel %vm428_vm0, %v432_v29, %v433_v30  ;;  %v1036_v37 = vld [vmem:[%s1547_s0 + $0x8] sm:$0x70]  ;;  %v389_v39 = vrot.slane %v366_v7, 1  ;;  %v390_v40 = vrot.slane %v368_v8, 2  ;;  %v1240_v41 = vor.u32 %v1035_v35, %v889_v34  ;;  %s1111_s21 = smov 96   ;;  %v1061_v13 = vld [vmem:[%s1553_s6 + $0x30] sm:$0xff] }
   0xf   :  { %437 = vrot.lane.b32.xlu2 %v434_v31, %s1109_s1  ;;  %v1242_v42 = vor.u32 %v1036_v37, %v893_v36  ;;  %v384_v43 = vrot.slane %v1208_v4, 1  ;;  %v378_v45 = vor.u32 %v377_v38, %v373_v11  ;;  %v392_v50 = vrot.slane %v373_v11, 1  ;;  %v1062_v11 = vld [vmem:[%s1553_s6 + $0x38] sm:$0xff]  ;;  %v1069_v14 = vld [vmem:[%s1553_s6 + $0x70] sm:$0xff]  ;;  %v1060_v15 = vld [vmem:[%s1553_s6 + $0x28] sm:$0xff]  ;;  %s878_s18 = sshll.u32 %s1562_s15, 4  ;;  %s879_s18 = int_to_ptr.hbm [resolvable:$true] %s878_s18 }
  0x10   :  { %v391_v46 = vor.u32 %v390_v40, %v389_v39  ;;  %v71_v47 = vshll.u32 %v1240_v41, 16  ;;  %v393_v51 = vrot.slane %v375_v12, 2  ;;  %v69_v52 = vshrl.u32 %v1240_v41, 16  ;;  %v1070_v12 = vld [vmem:[%s1553_s6 + $0x78] sm:$0xff]  ;;  %641 = vmatpush.bf16.msra.mxu3 %v1062_v11  ;;  %v1068_v16 = vld [vmem:[%s1553_s6 + $0x68] sm:$0xff]  ;;  %v1059_v18 = vld [vmem:[%s1553_s6 + $0x20] sm:$0xff] }
  0x11   :  { %v78_v44 = vshll.u32 %v1242_v42, 16  ;;  %v76_v49 = vshrl.u32 %v1242_v42, 16  ;;  %v86_v60 = vrot.slane %v1240_v41, 1  ;;  %v87_v61 = vrot.slane %v1242_v42, 1  ;;  %659 = vmatpush.bf16.msra.mxu2 %v1070_v12  ;;  %v1044_v17 = vld [vmem:[%s1550_s3 + $0x38] sm:$0xff]  ;;  %v1067_v19 = vld [vmem:[%s1553_s6 + $0x60] sm:$0xff] }
  0x12   :  { %426 = vrot.lane.b32.xlu1 %v423_v33, %s1110_s14  ;;  %v73_v53 = vrot.slane %v71_v47, 1  ;;  %v394_v55 = vor.u32 %v393_v51, %v392_v50  ;;  %v92_v57 = vrot.slane %v69_v52, 1  ;;  %v93_v58 = vrot.slane %v71_v47, 2  ;;  %294 = vmatpush.bf16.msra.mxu0 %v1044_v17  ;;  %v1043_v20 = vld [vmem:[%s1550_s3 + $0x30] sm:$0xff]  ;;  %v1058_v21 = vld [vmem:[%s1553_s6 + $0x18] sm:$0xff]  ;;  %v1042_v23 = vld [vmem:[%s1550_s3 + $0x28] sm:$0xff] }
  0x13   :  { %424 = vrot.lane.b32.xlu0 %v415_v32, %s1110_s14  ;;  %v80_v48 = vrot.slane %v78_v44, 1  ;;  %v107_v62 = vrot.slane %v76_v49, 2  ;;  %v108_v63 = vrot.slane %v78_v44, 3  ;;  %v95_v0 = vrot.slane %v76_v49, 1  ;;  %v1066_v22 = vld [vmem:[%s1553_s6 + $0x58] sm:$0xff]  ;;  %v1057_v24 = vld [vmem:[%s1553_s6 + $0x10] sm:$0xff] }
  0x14   :  { %v74_v56 = vor.u32 %v73_v53, %v69_v52  ;;  %v94_v59 = vor.u32 %v93_v58, %v92_v57  ;;  %v96_v2 = vrot.slane %v78_v44, 2  ;;  %v104_v3 = vrot.slane %v69_v52, 2  ;;  %642 = vmatpush.bf16.msra.mxu3 %v1061_v13  ;;  %v1065_v25 = vld [vmem:[%s1553_s6 + $0x50] sm:$0xff]  ;;  %v1052_v26 = vld [vmem:[%s1550_s3 + $0x78] sm:$0xff]  ;;  %v1041_v27 = vld [vmem:[%s1550_s3 + $0x20] sm:$0xff] }
  0x15   :  { %v81_v54 = vor.u32 %v80_v48, %v76_v49  ;;  %v105_v5 = vrot.slane %v71_v47, 3  ;;  %v109_v6 = vor.u32 %v108_v63, %v107_v62  ;;  %v114_v9 = vrot.slane %v1240_v41, 3  ;;  %660 = vmatpush.bf16.msra.mxu2 %v1069_v14  ;;  %308 = vmatpush.bf16.msra.mxu1 %v1052_v26  ;;  %v1056_v29 = vld [vmem:[%s1553_s6 + $0x8] sm:$0xff]  ;;  %v1051_v31 = vld [vmem:[%s1550_s3 + $0x70] sm:$0xff]  ;;  %v1040_v32 = vld [vmem:[%s1550_s3 + $0x18] sm:$0xff] }
  0x16   :  { %v97_v7 = vor.u32 %v96_v2, %v95_v0  ;;  %v115_v10 = vrot.slane %v1242_v42, 3  ;;  %295 = vmatpush.bf16.msra.mxu0 %v1043_v20  ;;  %v1064_v30 = vld [vmem:[%s1553_s6 + $0x48] sm:$0xff]  ;;  %v1055_v33 = vld [vmem:[%s1553_s6] sm:$0xff]  ;;  %v1039_v38 = vld [vmem:[%s1550_s3 + $0x10] sm:$0xff]  ;;  %vm120_vm2 = vcmask 261120   ;;  %vm127_vm3 = vcmask 523264  }
  0x17   :  { %387 = vrot.lane.b32.xlu2 %v384_v43, %s1109_s1  ;;  %v106_v8 = vor.u32 %v105_v5, %v104_v3  ;;  %v1063_v34 = vld [vmem:[%s1553_s6 + $0x40] sm:$0xff]  ;;  %v1050_v35 = vld [vmem:[%s1550_s3 + $0x68] sm:$0xff]  ;;  %v399_v43 = vrot.slane %v1200_v1, 2  ;;  %vm132_vm4 = vcmask 785408   ;;  %v1047_v51 = vld [vmem:[%s1550_s3 + $0x50] sm:$0xff]  ;;  %v400_v52 = vrot.slane %v1208_v4, 2 }
  0x18   :  { %643 = vmatpush.bf16.msra.mxu3 %v1060_v15  ;;  %v1049_v39 = vld [vmem:[%s1550_s3 + $0x60] sm:$0xff]  ;;  %v1038_v40 = vld [vmem:[%s1550_s3 + $0x8] sm:$0xff]  ;;  %vm467_vm5 = vcmask 1041408   ;;  %vm470_vm6 = vcmask 1043458   ;;  %vm474_vm7 = vcmask 1045508   ;;  %vm681_vm8 = vcmask 195584  }
  0x19   :  { %661 = vmatpush.bf16.msra.mxu2 %v1068_v16  ;;  %309 = vmatpush.bf16.msra.mxu1 %v1051_v31  ;;  %v1037_v50 = vld [vmem:[%s1550_s3] sm:$0xff]  ;;  %v1046_v57 = vld [vmem:[%s1550_s3 + $0x48] sm:$0xff]  ;;  %vm325_vm9 = vcmask 130048   ;;  %vm718_vm10 = vcmask 64512   ;;  %vm852_vm11 = vcmask 517120   ;;  %vm869_vm12 = vcmask 8192  }
  0x1a   :  { %395 = vrot.lane.b32.xlu1 %v391_v46, %s1111_s21  ;;  %296 = vmatpush.bf16.msra.mxu0 %v1042_v23 }
  0x1b   :  { %381 = vrot.lane.b32.xlu0 %v378_v45, %s1110_s14  ;;  %v1048_v45 = vld [vmem:[%s1550_s3 + $0x58] sm:$0xff] }
  0x1c   :  { %644 = vmatpush.bf16.msra.mxu3 %v1059_v18 }
  0x1d   :  { %662 = vmatpush.bf16.msra.mxu2 %v1067_v19  ;;  %310 = vmatpush.bf16.msra.mxu1 %v1050_v35 }
  0x1e   :  { %297 = vmatpush.bf16.msra.mxu0 %v1041_v27  ;;  %v705_v27 = vld [vmem:[%s1549_s2] sm:$0x1] }
  0x1f   :  { %84 = vrot.lane.b32.xlu2 %v81_v54, %s1110_s14 }
  0x20   :  { %645 = vmatpush.bf16.msra.mxu3 %v1058_v21 }
  0x21   :  { %663 = vmatpush.bf16.msra.mxu2 %v1066_v22  ;;  %311 = vmatpush.bf16.msra.mxu1 %v1049_v39  ;;  %v56_v22 = vld [vmem:[%s1547_s0 + $0x8] sm:$0xf] }
  0x22   :  { %82 = vrot.lane.b32.xlu1 %v74_v56, %s1110_s14  ;;  %298 = vmatpush.bf16.msra.mxu0 %v1040_v32 }
  0x23   :  { %397 = vrot.lane.b32.xlu0 %v394_v55, %s1111_s21 }
  0x24   :  { %646 = vmatpush.bf16.msra.mxu3 %v1057_v24 }
  0x25   :  { %664 = vmatpush.bf16.msra.mxu2 %v1065_v25  ;;  %312 = vmatpush.bf16.msra.mxu1 %v1048_v45 }
  0x26   :  { %299 = vmatpush.bf16.msra.mxu0 %v1039_v38 }
  0x27   :  { %98 = vrot.lane.b32.xlu2 %v94_v59, %s1111_s21 }
  0x28   :  { %647 = vmatpush.bf16.msra.mxu3 %v1056_v29  ;;  %v706_v29 = vld [vmem:[%s1549_s2 + $0x1] sm:$0x1] }
  0x29   :  { %665 = vmatpush.bf16.msra.mxu2 %v1064_v30  ;;  %313 = vmatpush.bf16.msra.mxu1 %v1047_v51 }
  0x2a   :  { %90 = vrot.lane.b32.xlu1 %v87_v61, %s1109_s1  ;;  %300 = vmatpush.bf16.msra.mxu0 %v1038_v40  ;;  %v103_v40 = vrot.slane %v1242_v42, 2 }
  0x2b   :  { %88 = vrot.lane.b32.xlu0 %v86_v60, %s1109_s1 }
  0x2c   :  { %648 = vmatpush.bf16.msra.mxu3 %v1055_v33 }
  0x2d   :  { %666 = vmatpush.bf16.msra.mxu2 %v1063_v34  ;;  %314 = vmatpush.bf16.msra.mxu1 %v1046_v57  ;;  %v772_v57 = vld [vmem:[%s1558_s11 + $0xf8] sm:$0xff] }
  0x2e   :  { %301 = vmatpush.bf16.msra.mxu0 %v1037_v50 }
  0x2f   :  { %112 = vrot.lane.b32.xlu2 %v109_v6, %s1110_s14  ;;  %v1045_v6 = vld [vmem:[%s1550_s3 + $0x40] sm:$0xff] }
  0x30   :  { %777 = vmatpush.msrb.mxu3 %v772_v57  ;;  %v775_v57 = vld [vmem:[%s1558_s11 + $0x110] sm:$0xff] }
  0x31   :  { %315 = vmatpush.bf16.msra.mxu1 %v1045_v6  ;;  %v752_v6 = vld [vmem:[%s1558_s11 + $0x58] sm:$0xff] }
  0x32   :  { %110 = vrot.lane.b32.xlu1 %v106_v8, %s1110_s14 }
  0x33   :  { %100 = vrot.lane.b32.xlu0 %v97_v7, %s1111_s21 }
  0x3a   :  { %118 = vrot.lane.b32.xlu1 %v115_v10, %s1109_s1 }
  0x3b   :  { %116 = vrot.lane.b32.xlu0 %v114_v9, %s1109_s1 }
  0x61   :  { %v386_v28 = vpop.permute.xlu2 %385 }
  0x69   :  { %v438_v44 = vpop.permute.xlu2 %437 }
  0x71   :  { %v388_v56 = vpop.permute.xlu2 %387 }
  0x79   :  { %v85_v14 = vpop.permute.xlu2 %84 }
  0x7a   :  { %v126_v30 = vsel %vm120_vm2, %v56_v22, %v85_v14  ;;  %v766_v14 = vld [vmem:[%s1558_s11 + $0xc8] sm:$0xff] }
  0x7c   :  { %v380_v37 = vpop.permute.xlu1 %379 }
  0x7d   :  { %v436_v36 = vpop.permute.xlu0 %435  ;;  %v440_v53 = vsel %vm120_vm2, %v1200_v1, %v380_v37 }
  0x7e   :  { %v444_v60 = vsel %vm127_vm3, %v440_v53, %v386_v28 }
  0x81   :  { %v99_v26 = vpop.permute.xlu2 %98 }
  0x84   :  { %v427_v47 = vpop.permute.xlu1 %426 }
  0x85   :  { %v425_v46 = vpop.permute.xlu0 %424  ;;  %v456_v55 = vsel %vm120_vm2, %v400_v52, %v427_v47 }
  0x86   :  { %v453_v48 = vsel %vm120_vm2, %v399_v43, %v425_v46  ;;  %v460_v62 = vsel %vm127_vm3, %v456_v55, %v438_v44  ;;  %v102_v44 = vrot.slane %v1240_v41, 2 }
  0x87   :  { %v458_v49 = vsel %vm127_vm3, %v453_v48, %v436_v36  ;;  %v462_v7 = vsel %vm132_vm4, %v460_v62, 0 }
  0x88   :  { %v461_v54 = vsel %vm132_vm4, %v458_v49, 0  ;;  %v466_v9 = vrot.slane %v462_v7, 6  ;;  %v1078_v7 = vld [vmem:[%s1554_s7] ss:$0 sm:$0xff] }
  0x89   :  { %v465_v58 = vrot.slane %v461_v54, 6  ;;  %v113_v43 = vpop.permute.xlu2 %112 }
  0x8a   :  { %v142_v46 = vsel %vm120_vm2, %v103_v40, %v113_v43  ;;  %v762_v40 = vld [vmem:[%s1558_s11 + $0xa8] sm:$0xff] }
  0x8b   :  { %v746_v43 = vld [vmem:[%s1558_s11 + $0x28] sm:$0xff] }
  0x8c   :  { %v396_v61 = vpop.permute.xlu1 %395 }
  0x8d   :  { %v382_v59 = vpop.permute.xlu0 %381  ;;  %v448_v1 = vsel %vm132_vm4, %v444_v60, %v396_v61  ;;  %v755_v61 = vld [vmem:[%s1558_s11 + $0x70] sm:$0xff] }
  0x8e   :  { %v469_v63 = vsel %vm467_vm5, %v448_v1, %v465_v58  ;;  %v471_v0 = vsel %vm470_vm6, %v448_v1, %v465_v58  ;;  %v475_v2 = vsel %vm474_vm7, %v448_v1, %v465_v58  ;;  %v442_v8 = vsel %vm120_vm2, %v1208_v4, %v382_v59  ;;  %v54_v4 = vld [vmem:[%s1547_s0] sm:$0xf]  ;;  %v756_v58 = vld [vmem:[%s1558_s11 + $0x78] sm:$0xff]  ;;  %v771_v59 = vld [vmem:[%s1558_s11 + $0xf0] sm:$0xff] }
  0x8f   :  { %v473_v3 = vrot.slane %v471_v0, 2  ;;  %v477_v5 = vrot.slane %v475_v2, 4  ;;  %522 = vst [vmem:[#allocation1] ss:$4 sm:$0xff] %v469_v63  ;;  %v446_v10 = vsel %vm127_vm3, %v442_v8, %v388_v56  ;;  %797 = vmatpush.msrb.mxu2 %v756_v58  ;;  %v770_v63 = vld [vmem:[%s1558_s11 + $0xe8] sm:$0xff]  ;;  %778 = vmatpush.msrb.mxu3 %v771_v59  ;;  %v769_v2 = vld [vmem:[%s1558_s11 + $0xe0] sm:$0xff] }
  0x90   :  { %v754_v0 = vld [vmem:[%s1558_s11 + $0x68] sm:$0xff]  ;;  %v773_v59 = vld [vmem:[%s1558_s11 + $0x100] sm:$0xff] }
  0x91   :  { %525 = vst [vmem:[#allocation1 + $0x1] ss:$4 sm:$0xff] %v473_v3  ;;  %798 = vmatpush.msrb.mxu2 %v755_v61  ;;  %v753_v3 = vld [vmem:[%s1558_s11 + $0x60] sm:$0xff]  ;;  %779 = vmatpush.msrb.mxu3 %v770_v63  ;;  %v774_v58 = vld [vmem:[%s1558_s11 + $0x108] sm:$0xff] }
  0x92   :  { %528 = vst [vmem:[#allocation1 + $0x2] ss:$4 sm:$0xff] %v477_v5  ;;  %v768_v5 = vld [vmem:[%s1558_s11 + $0xd8] sm:$0xff] }
  0x93   :  { %799 = vmatpush.msrb.mxu2 %v754_v0  ;;  %780 = vmatpush.msrb.mxu3 %v769_v2  ;;  %v856_v0 = vld [vmem:[#allocation2] sm:$0x1]  ;;  %v1112_v2 = vmov 0  }
  0x94   :  { %v83_v12 = vpop.permute.xlu1 %82  ;;  %1076 = vset.pattern.permute.xlu2 %v1112_v2  ;;  %1077 = vset.pattern.permute.xlu0 %v1112_v2 }
  0x95   :  { %v398_v11 = vpop.permute.xlu0 %397  ;;  %v123_v25 = vsel %vm120_vm2, %v54_v4, %v83_v12  ;;  %800 = vmatpush.msrb.mxu2 %v753_v3  ;;  %781 = vmatpush.msrb.mxu3 %v768_v5  ;;  %v765_v4 = vld [vmem:[%s1558_s11 + $0xc0] sm:$0xff] }
  0x96   :  { %v450_v13 = vsel %vm132_vm4, %v446_v10, %v398_v11  ;;  %v751_v10 = vld [vmem:[%s1558_s11 + $0x50] sm:$0xff]  ;;  %859 = vperm.xlu2 %1076, %v856_v0  }
  0x97   :  { %v479_v15 = vsel %vm467_vm5, %v450_v13, %v466_v9  ;;  %v480_v16 = vsel %vm470_vm6, %v450_v13, %v466_v9  ;;  %v483_v17 = vsel %vm474_vm7, %v450_v13, %v466_v9  ;;  %v767_v9 = vld [vmem:[%s1558_s11 + $0xd0] sm:$0xff]  ;;  %801 = vmatpush.msrb.mxu2 %v752_v6 }
  0x98   :  { %v482_v18 = vrot.slane %v480_v16, 2  ;;  %v485_v19 = vrot.slane %v483_v17, 4  ;;  %530 = vst [vmem:[#allocation1 + $0x3] ss:$4 sm:$0xff] %v479_v15  ;;  %v750_v15 = vld [vmem:[%s1558_s11 + $0x48] sm:$0xff]  ;;  %782 = vmatpush.msrb.mxu3 %v767_v9 }
  0x99   :  { %v1079_v17 = vld [vmem:[%s1551_s4] ss:$0 sm:$0xff]  ;;  %802 = vmatpush.msrb.mxu2 %v751_v10 }
  0x9a   :  { %533 = vst [vmem:[#allocation1 + $0x20] ss:$4 sm:$0xff] %v482_v18  ;;  %783 = vmatpush.msrb.mxu3 %v766_v14 }
  0x9b   :  { %536 = vst [vmem:[#allocation1 + $0x21] ss:$4 sm:$0xff] %v485_v19  ;;  %803 = vmatpush.msrb.mxu2 %v750_v15 }
  0x9c   :  { %v91_v21 = vpop.permute.xlu1 %90  ;;  %784 = vmatpush.msrb.mxu3 %v765_v4 }
  0x9d   :  { %v89_v20 = vpop.permute.xlu0 %88  ;;  %v131_v34 = vsel %vm127_vm3, %v126_v30, %v91_v21  ;;  %v763_v30 = vld [vmem:[%s1558_s11 + $0xb0] sm:$0xff] }
  0x9e   :  { %v129_v28 = vsel %vm127_vm3, %v123_v25, %v89_v20  ;;  %v749_v20 = vld [vmem:[%s1558_s11 + $0x40] sm:$0xff] }
  0x9f   :  { %v537_v23 = vld.sshfl [vmem:[#allocation1] sm:$0xff pattern:$0x73625140]  ;;  %v538_v24 = vld.sshfl [vmem:[#allocation1 + $0x8] sm:$0xff pattern:$0x73625140]  ;;  %v134_v33 = vsel %vm132_vm4, %v129_v28, %v99_v26  ;;  %804 = vmatpush.msrb.mxu2 %v749_v20 }
  0xa0   :  { %649 = vmatmul.bf16.vlgmr.msra.gmra.mxu3 %v537_v23  ;;  %667 = vmatmul.bf16.vlgmr.msra.gmra.mxu2 %v538_v24  ;;  %v154_v38 = vunpack.c.l.b16 %v134_v33  ;;  %v764_v23 = vld [vmem:[%s1558_s11 + $0xb8] sm:$0xff] }
  0xa1   :  { %v748_v28 = vld [vmem:[%s1558_s11 + $0x38] sm:$0xff]  ;;  %785 = vmatpush.msrb.mxu3 %v764_v23 }
  0xa2   :  { %v539_v31 = vld.sshfl [vmem:[#allocation1 + $0x20] sm:$0xff pattern:$0x73625140]  ;;  %v540_v32 = vld.sshfl [vmem:[#allocation1 + $0x28] sm:$0xff pattern:$0x73625140]  ;;  %805 = vmatpush.msrb.mxu2 %v748_v28 }
  0xa3   :  { %714 = vst [vmem:[#allocation1] ss:$9 sm:$0xff] %v705_v27  ;;  %786 = vmatpush.msrb.mxu3 %v763_v30 }
  0xa4   :  { %716 = vst [vmem:[#allocation1 + $0x1] ss:$9 sm:$0xff] %v706_v29  ;;  %v111_v36 = vpop.permute.xlu1 %110 }
  0xa5   :  { %v101_v35 = vpop.permute.xlu0 %100  ;;  %v139_v47 = vsel %vm120_vm2, %v102_v44, %v111_v36  ;;  %787 = vmatpush.msrb.mxu3 %v762_v40 }
  0xa6   :  { %v136_v37 = vsel %vm132_vm4, %v131_v34, %v101_v35  ;;  %v747_v34 = vld [vmem:[%s1558_s11 + $0x30] sm:$0xff] }
  0xa7   :  { %v156_v39 = vunpack.c.l.b16 %v136_v37  ;;  %806 = vmatpush.msrb.mxu2 %v747_v34 }
  0xa9   :  { %v194_v45 = vpack.c.b16 %v156_v39, %v154_v38  ;;  %v680_v39 = vld [vmem:[%s1555_s8] sm:$0x3]  ;;  %807 = vmatpush.msrb.mxu2 %v746_v43 }
  0xab   :  { %302 = vmatmul.bf16.vlgmr.msra.gmra.mxu0 %v194_v45  ;;  %v324_v45 = vld [vmem:[%s1552_s5] sm:$0x3]  ;;  %s1113_s5 = smov [#allocation3]  }
  0xac   :  { %v119_v49 = vpop.permute.xlu1 %118  ;;  %s876_s17 = sshll.u32 %s1113_s5, 4  ;;  %s877_s17 = int_to_ptr.vmem [resolvable:$true] %s876_s17 }
  0xad   :  { %v117_v48 = vpop.permute.xlu0 %116  ;;  %v146_v51 = vsel %vm127_vm3, %v142_v46, %v119_v49  ;;  %v761_v46 = vld [vmem:[%s1558_s11 + $0xa0] sm:$0xff]  ;;  %v760_v49 = vld [vmem:[%s1558_s11 + $0x98] sm:$0xff] }
  0xae   :  { %v144_v50 = vsel %vm127_vm3, %v139_v47, %v117_v48  ;;  %v149_v53 = vsel %vm132_vm4, %v146_v51, 0  ;;  %v707_v47 = vld [vmem:[%s1556_s9] sm:$0xff]  ;;  %788 = vmatpush.msrb.mxu3 %v761_v46  ;;  %v759_v51 = vld [vmem:[%s1558_s11 + $0x90] sm:$0xff] }
  0xaf   :  { %v148_v52 = vsel %vm132_vm4, %v144_v50, 0  ;;  %v157_v54 = vunpack.c.l.b16 %v149_v53  ;;  %v745_v48 = vld [vmem:[%s1558_s11 + $0x20] sm:$0xff]  ;;  %v744_v50 = vld [vmem:[%s1558_s11 + $0x18] sm:$0xff] }
  0xb0   :  { %v155_v42 = vunpack.c.l.b16 %v148_v52  ;;  %654 = vmatmul.bf16.gmra.mxu3 %v539_v31  ;;  %672 = vmatmul.bf16.gmra.mxu2 %v540_v32  ;;  %v743_v52 = vld [vmem:[%s1558_s11 + $0x10] sm:$0xff]  ;;  %v717_v53 = vld [vmem:[#allocation1] sm:$0xff] }
  0xb1   :  { %808 = vmatpush.msrb.mxu2 %v745_v48  ;;  %789 = vmatpush.msrb.mxu3 %v760_v49 }
  0xb2   :  { %v195_v41 = vpack.c.b16 %v157_v54, %v155_v42  ;;  %v758_v42 = vld [vmem:[%s1558_s11 + $0x88] sm:$0xff] }
  0xb3   :  { %809 = vmatpush.msrb.mxu2 %v744_v50  ;;  %790 = vmatpush.msrb.mxu3 %v759_v51  ;;  %v742_v54 = vld [vmem:[%s1558_s11 + $0x8] sm:$0xff] }
  0xb4   :  { %316 = vmatmul.bf16.vlgmr.msra.gmra.mxu1 %v195_v41  ;;  %v757_v41 = vld [vmem:[%s1558_s11 + $0x80] sm:$0xff] }
  0xb5   :  { %810 = vmatpush.msrb.mxu2 %v743_v52  ;;  %791 = vmatpush.msrb.mxu3 %v758_v42 }
  0xb7   :  { %811 = vmatpush.msrb.mxu2 %v742_v54  ;;  %792 = vmatpush.msrb.mxu3 %v757_v41 }
  0xf0   :  { %v860_v15 = vpop.permute.xlu2 %859 }
 0x123   :  { %v650_v55 = vpop.f32.mrf.mxu3  ;;  %v668_v56 = vpop.f32.mrf.mxu2 }
 0x124   :  { %v651_v16 = vadd.f32 %v1078_v7, %v650_v55  ;;  %v741_v55 = vld [vmem:[%s1558_s11] sm:$0xff] }
 0x125   :  { %812 = vmatpush.msrb.mxu2 %v741_v55 }
 0x126   :  { %v669_v24 = vadd.f32 %v668_v56, %v651_v16  ;;  %v776_v56 = vld [vmem:[%s1558_s11 + $0x118] sm:$0xff]  ;;  %v865_v16 = vlaneseq }
 0x128   :  { %v303_v60 = vpop.f32.mrf.mxu0  ;;  %v677_v37 = vmax.f32 %v669_v24, 0.0 }
 0x129   :  { %v304_v25 = vadd.f32 %v1079_v17, %v303_v60 }
 0x12b   :  { %v652_v1 = vpop.f32.mrf.mxu3  ;;  %v670_v62 = vpop.f32.mrf.mxu2 }
 0x12c   :  { %v653_v11 = vadd.f32 %v1078_v7, %v652_v1  ;;  %v1080_v1 = vld [vmem:[%s1557_s10] ss:$0 sm:$0xff] }
 0x12e   :  { %v671_v21 = vadd.f32 %v670_v62, %v653_v11  ;;  %v1082_v11 = vld [vmem:[%s1560_s13] ss:$0 sm:$0xff] }
 0x130   :  { %v305_v19 = vpop.f32.mrf.mxu0  ;;  %v678_v31 = vmax.f32 %v671_v21, 0.0 }
 0x131   :  { %v317_v8 = vpop.f32.mrf.mxu1  ;;  %v306_v26 = vadd.f32 %v1079_v17, %v305_v19  ;;  %v862_v17 = vperm.slane %v860_v15, 0 }
 0x132   :  { %v318_v32 = vadd.f32 %v317_v8, %v304_v25 }
 0x133   :  { %v655_v12 = vpop.f32.mrf.mxu3  ;;  %v673_v13 = vpop.f32.mrf.mxu2 }
 0x134   :  { %v656_v18 = vadd.f32 %v1078_v7, %v655_v12  ;;  %v322_v44 = vmax.f32 %v318_v32, 0.0  ;;  %v1081_v7 = vld [vmem:[%s1559_s12] ss:$0 sm:$0xff] }
 0x136   :  { %v674_v22 = vadd.f32 %v673_v13, %v656_v18  ;;  %v866_v18 = vand.u32 127, %v865_v16 }
 0x138   :  { %v679_v27 = vmax.f32 %v674_v22, 0.0 }
 0x139   :  { %v319_v29 = vpop.f32.mrf.mxu1 }
 0x13a   :  { %v320_v33 = vadd.f32 %v319_v29, %v306_v26  ;;  %698 = vmatpush.msrb.mxu0 %v679_v27 }
 0x13b   :  { %v657_v35 = vpop.f32.mrf.mxu3  ;;  %v675_v36 = vpop.f32.mrf.mxu2 }
 0x13c   :  { %v323_v38 = vmax.f32 %v320_v33, 0.0  ;;  %699 = vmatpush.msrb.mxu0 %v678_v31 }
 0x13e   :  { %700 = vmatpush.msrb.mxu0 %v677_v37  ;;  %343 = vmatpush.msrb.mxu1 %v323_v38 }
 0x13f   :  { %1032 = vmatmul.msk.f32.vlgmr.msrb.gmra.mxu0 %vm681_vm8, %v680_v39 }
 0x140   :  { %344 = vmatpush.msrb.mxu1 %v322_v44  ;;  %832 = vmatpush.msra.mxu0 %v776_v56 }
 0x141   :  { %959 = vmatmul.msk.f32.vlgmr.msrb.gmra.mxu1 %vm325_vm9, %v324_v45 }
 0x142   :  { %736 = vmatpush.msra.mxu1 %v707_v47  ;;  %833 = vmatpush.msra.mxu0 %v775_v57 }
 0x144   :  { %834 = vmatpush.msra.mxu0 %v774_v58 }
 0x146   :  { %835 = vmatpush.msra.mxu0 %v773_v59 }
 0x149   :  { %1033 = vmatmul.msk.f32.vlgmr.msra.gmra.mxu1 %vm718_vm10, %v717_v53 }
 0x1bc   :  { %v702_v60 = vpop.f32.mrf.mxu0 }
 0x1bd   :  { %793 = vmatmul.f32.vlgmr.msrb.gmra.mxu3 %v702_v60 }
 0x1be   :  { %v346_v61 = vpop.f32.mrf.mxu1 }
 0x1bf   :  { %813 = vmatmul.f32.vlgmr.msrb.gmra.mxu2 %v346_v61 }
 0x1c6   :  { %v738_v62 = vpop.f32.mrf.mxu1 }
 0x1c7   :  { %v739_v63 = vadd.f32 %v1080_v1, %v738_v62 }
 0x1c9   :  { %1034 = vmatmul.msk.f32.vlgmr.msra.gmra.mxu0 %vm120_vm2, %v739_v63 }
 0x240   :  { %v794_v3 = vpop.f32.mrf.mxu3 }
 0x242   :  { %v814_v5 = vpop.f32.mrf.mxu2 }
 0x243   :  { %v815_v6 = vadd.f32 %v814_v5, %v794_v3 }
 0x246   :  { %v837_v8 = vpop.f32.mrf.mxu0 }
 0x247   :  { %v840_v9 = vadd.f32 %v837_v8, %v815_v6 }
 0x249   :  { %v845_v10 = vadd.f32 %v1081_v7, %v840_v9 }
 0x24b   :  { %v846_v12 = vmax.f32 %v845_v10, 0.0 }
 0x24d   :  { %v851_v13 = vmul.f32 %v1082_v11, %v846_v12 }
 0x24f   :  { %v853_v14 = vsel %vm852_vm11, %v851_v13, 0.0 }
 0x250   :  { %854 = vadd.xlane.f32.xlu0 %v853_v14 }
 0x2c3   :  { %v855_v19 = vpop.xlane.xlu0 %854 }
 0x2c4   :  { %v863_v4 = vadd.f32 %v862_v17, %v855_v19 }
 0x2c6   :  { %v867_v20 = vperm.slane %v863_v4, %v866_v18 }
 0x2c8   :  { %870 = vst.msk [vmem:[#allocation3] sm:$0x1] %vm869_vm12, %v867_v20 }
 0x2c9   :  { %881 = dma.vmem_to_hbm [thread:$0]  %s877_s17, 16, %s879_s18, [#allocation4]  }
 0x2ca   :  { %1107 = dma.done.wait [#allocation4], 16  }
 0x2cb   :  { %1108 = vsyncadd [#allocation4], 4294967280 }
 0x2cc   :  { %886 = vsyncpa [#allocation4], 1 }

</bundles_post_ra>
